<compile_context>
chip_gen: v5e
topology: v5e:2x2
jax: 0.10.0
libtpu: 0.0.40
codegen_flags: <defaults>
</compile_context>

<pallas_src>
import jax
import jax.numpy as jnp
from jax.experimental import pallas as pl
from jax.experimental.pallas import tpu as pltpu

_MIB = 1024 * 1024


def _round_up(x, m):
    return (x + m - 1) // m * m


def _round_down_mult(x, m):
    return max(m, (x // m) * m)


def _pick_tff(d_ff, tff_target):
    """Legal d_ff tile: prefer multiples of 256 (2x256 MXU on v6e/v7x), fall
    back to 128-multiples (v5e), else keep the full d_ff (single step)."""
    if d_ff <= tff_target:
        return d_ff
    for step in (256, 128):
        if d_ff % step == 0:
            cand = max(step, (tff_target // step) * step)
            while cand >= step:
                if d_ff % cand == 0:
                    return cand
                cand -= step
    return d_ff


def _vmem_capacity_bytes():
    try:
        return int(pltpu.get_tpu_info().vmem_capacity_bytes)
    except Exception:
        return 64 * _MIB  # conservative (v7x-sized) fallback


def _tile_vmem_bytes(tm, tff, d_model, cdt, odt, single_step, wbuf):
    """Estimate of live VMEM for one pipeline configuration (bytes)."""
    x_t = 2 * tm * d_model * cdt            # double-buffered x tile
    o_t = 2 * tm * d_model * odt            # double-buffered out tile
    w_t = wbuf * (2 * d_model * tff) * cdt  # W1 + W2 tiles (wbuf-deep)
    b_t = wbuf * (tff + d_model) * 4        # biases (f32)
    acc = 0 if single_step else tm * d_model * 4  # resident f32 accumulator
    h_t = tm * tff * (4 + cdt)              # hidden (f32 + downcast copy)
    return x_t + o_t + w_t + b_t + acc + h_t


def ffn_kernel_tiled(x_ref, w1_ref, b1_ref, w2_ref, b2_ref, o_ref, acc_ref):
    # x_ref:(tm,d_model) w1_ref:(d_model,tff) b1_ref:(1,tff)
    # w2_ref:(tff,d_model) b2_ref:(1,d_model) o_ref:(tm,d_model)
    # acc_ref:(tm,d_model) f32, resident across the d_ff ("arbitrary") axis.
    j = pl.program_id(1)

    @pl.when(j == 0)
    def _():
        acc_ref[...] = jnp.zeros_like(acc_ref)

    # fc1 slice on the MXU (f32 accumulation); bias + ReLU in f32 on the VPU.
    h = jnp.dot(x_ref[...], w1_ref[...], preferred_element_type=jnp.float32)
    h = jnp.maximum(h + b1_ref[...], 0.0)

    # fc2 slice: downcast activations to the weight dtype for the MXU,
    # accumulate into the resident f32 scratch.
    acc_ref[...] += jnp.dot(h.astype(w2_ref.dtype), w2_ref[...],
                            preferred_element_type=jnp.float32)

    # Epilogue: add output bias once and store.
    @pl.when(j == pl.num_programs(1) - 1)
    def _():
        o_ref[...] = (acc_ref[...] + b2_ref[...]).astype(o_ref.dtype)


def ffn_kernel_single(x_ref, w1_ref, b1_ref, w2_ref, b2_ref, o_ref):
    # Single d_ff step (resident weights): no accumulator scratch, no pl.when,
    # no extra tm*d_model f32 read-modify-write pass.
    h = jnp.dot(x_ref[...], w1_ref[...], preferred_element_type=jnp.float32)
    h = jnp.maximum(h + b1_ref[...], 0.0)
    acc = jnp.dot(h.astype(w2_ref.dtype), w2_ref[...],
                  preferred_element_type=jnp.float32)
    o_ref[...] = (acc + b2_ref[...]).astype(o_ref.dtype)


def position_wise_feed_forward(x, w1, b1, w2, b2, *, tm=None, tff=1024,
                               compute_dtype=None, resident_weights=None,
                               weight_buffer_count=2):
    """x: (batch, seq, d_model) -> (batch, seq, d_model).

    w1: (d_model, d_ff), b1: (d_ff,), w2: (d_ff, d_model), b2: (d_model,).

    compute_dtype: MXU operand dtype (accumulation is always f32). For f32
    inputs on v6e/v7x, passing jnp.bfloat16 is strongly recommended (~4x MXU
    throughput); it rounds the post-ReLU hidden to bf16 before fc2.
    resident_weights: None = auto (keep W1/W2 fully in VMEM when they fit the
    per-generation budget), True/False to force.
    weight_buffer_count: >2 adds pipeline depth on the W1/W2 tiles in tiled
    mode (hides exposed weight DMA on v6e at moderate row tiles).
    """
    batch, seq, d_model = x.shape
    d_ff = w1.shape[1]
    rows = batch * seq
    out_dtype = x.dtype

    if compute_dtype is None:
        compute_dtype = jnp.bfloat16 if x.dtype == jnp.bfloat16 else x.dtype
    compute_dtype = jnp.dtype(compute_dtype)
    cdt = compute_dtype.itemsize
    odt = jnp.dtype(out_dtype).itemsize

    # --- per-generation sizing -------------------------------------------
    vmem_cap = _vmem_capacity_bytes()
    small_vmem = vmem_cap < 96 * _MIB          # v7x-like: 64 MiB VMEM, 2 TCs
    if small_vmem:
        cap_limit = 52 * _MIB                   # leave Mosaic-scratch headroom
        resident_budget = 44 * _MIB
    else:
        cap_limit = 110 * _MIB                  # v5e/v6e: 128 MiB physical
        resident_budget = 100 * _MIB
    headroom = 8 * _MIB
    tile_budget = cap_limit - headroom

    # Row tile: sized against the FLOPs/byte roofline (in tiled mode, weights
    # are re-streamed once per row tile), sublane-packed for the compute dtype.
    sub = 16 if compute_dtype == jnp.bfloat16 else 8
    if tm is None:
        if small_vmem:
            tm = 512            # v7x: ~>=320 rows/TC makes weight traffic free
        else:
            tm = 1024 if compute_dtype == jnp.bfloat16 else 512
    tm_eff = max(sub, min(_round_up(tm, sub), _round_up(rows, sub)))
    if small_vmem and _round_up(rows, sub) >= 2 * sub:
        # Keep >=2 row tiles so the "parallel" axis shards across both TCs.
        tm_eff = min(tm_eff, _round_up(rows, 2 * sub) // 2)

    # Resident-weights decision (weights DMA'd once, single reduction step).
    if resident_weights is None:
        resident = (_tile_vmem_bytes(tm_eff, d_ff, d_model, cdt, odt,
                                     True, 2) <= resident_budget)
    else:
        resident = bool(resident_weights)

    tff_eff = d_ff if resident else _pick_tff(d_ff, tff)
    single_step = (tff_eff == d_ff)
    wbuf = 2 if single_step else max(2, int(weight_buffer_count))

    # Shrink the row tile if the chosen tiles would overflow the VMEM budget.
    while (_tile_vmem_bytes(tm_eff, tff_eff, d_model, cdt, odt,
                            single_step, wbuf) > tile_budget
           and tm_eff > sub):
        tm_eff = _round_down_mult(tm_eff // 2, sub)
    rows_padded = _round_up(rows, tm_eff)
    n_row_tiles = rows_padded // tm_eff

    # --- inputs ------------------------------------------------------------
    x2d = x.reshape(rows, d_model).astype(compute_dtype)
    if rows_padded != rows:
        x2d = jnp.pad(x2d, ((0, rows_padded - rows), (0, 0)))
    w1c = w1.astype(compute_dtype)
    w2c = w2.astype(compute_dtype)
    b1_2d = b1.reshape(1, d_ff).astype(jnp.float32)
    b2_2d = b2.reshape(1, d_model).astype(jnp.float32)

    est = _tile_vmem_bytes(tm_eff, tff_eff, d_model, cdt, odt,
                           single_step, wbuf)
    vmem_limit = int(min(max(est + headroom, 16 * _MIB), cap_limit))

    # Honest HBM traffic: weights are re-streamed once per row tile only in
    # tiled mode; in resident mode (constant block index) they move once.
    restream = 1 if single_step else n_row_tiles
    weight_bytes = ((w1c.size + w2c.size) * cdt
                    + (b1_2d.size + b2_2d.size) * 4) * restream
    cost = pl.CostEstimate(
        flops=4 * rows * d_model * d_ff,       # two matmuls, 2 flops/MAC
        transcendentals=0,
        bytes_accessed=int(x2d.size * cdt + weight_bytes
                           + rows_padded * d_model * odt),
    )

    if single_step:
        grid = (n_row_tiles,)
        in_specs = [
            pl.BlockSpec((tm_eff, d_model), lambda i: (i, 0)),   # x rows
            pl.BlockSpec((d_model, d_ff), lambda i: (0, 0)),     # W1 (resident)
            pl.BlockSpec((1, d_ff), lambda i: (0, 0)),           # b1
            pl.BlockSpec((d_ff, d_model), lambda i: (0, 0)),     # W2 (resident)
            pl.BlockSpec((1, d_model), lambda i: (0, 0)),        # b2
        ]
        out_specs = pl.BlockSpec((tm_eff, d_model), lambda i: (i, 0))
        scratch = []
        kernel = ffn_kernel_single
        dims = ("parallel",)
    else:
        grid = (n_row_tiles, d_ff // tff_eff)
        w_kwargs = {}
        if wbuf != 2:
            w_kwargs = dict(pipeline_mode=pl.Buffered(wbuf))
        in_specs = [
            pl.BlockSpec((tm_eff, d_model), lambda i, j: (i, 0)),           # x
            pl.BlockSpec((d_model, tff_eff), lambda i, j: (0, j), **w_kwargs),  # W1
            pl.BlockSpec((1, tff_eff), lambda i, j: (0, j)),                # b1
            pl.BlockSpec((tff_eff, d_model), lambda i, j: (j, 0), **w_kwargs),  # W2
            pl.BlockSpec((1, d_model), lambda i, j: (0, 0)),                # b2
        ]
        out_specs = pl.BlockSpec((tm_eff, d_model), lambda i, j: (i, 0))
        scratch = [pltpu.VMEM((tm_eff, d_model), jnp.float32)]
        kernel = ffn_kernel_tiled
        dims = ("parallel", "arbitrary")

    out2d = pl.pallas_call(
        kernel,
        out_shape=jax.ShapeDtypeStruct((rows_padded, d_model), out_dtype),
        grid_spec=pltpu.PrefetchScalarGridSpec(
            num_scalar_prefetch=0,
            grid=grid,
            in_specs=in_specs,
            out_specs=out_specs,
            scratch_shapes=scratch,
        ),
        compiler_params=pltpu.CompilerParams(
            dimension_semantics=dims,
            vmem_limit_bytes=vmem_limit,
        ),
        cost_estimate=cost,
    )(x2d, w1c, b1_2d, w2c, b2_2d)

    return out2d[:rows].reshape(batch, seq, d_model)


def _make_params(key, d_model, d_ff):
    kw1, kb1, kw2, kb2 = jax.random.split(key, 4)
    bound1 = 1.0 / (d_model ** 0.5)
    bound2 = 1.0 / (d_ff ** 0.5)
    # Stored pre-transposed relative to PyTorch: W1 is [d_model, d_ff].
    w1 = jax.random.uniform(kw1, (d_model, d_ff), jnp.float32, -bound1, bound1)
    b1 = jax.random.uniform(kb1, (d_ff,), jnp.float32, -bound1, bound1)
    w2 = jax.random.uniform(kw2, (d_ff, d_model), jnp.float32, -bound2, bound2)
    b2 = jax.random.uniform(kb2, (d_model,), jnp.float32, -bound2, bound2)
    return w1, b1, w2, b2


def _ref(x, w1, b1, w2, b2):
    return jnp.maximum(x @ w1 + b1, 0.0) @ w2 + b2


if __name__ == "__main__":
    key = jax.random.PRNGKey(0)
    kx1, kp1, kx2, kp2, kx3 = jax.random.split(key, 5)

    # 1) Primary small-shape check (f32 end-to-end, resident-weights path).
    batch, seq, d_model, d_ff = 2, 8, 32, 64
    x = jax.random.normal(kx1, (batch, seq, d_model), dtype=jnp.float32)
    w1, b1, w2, b2 = _make_params(kp1, d_model, d_ff)
    out = jax.block_until_ready(position_wise_feed_forward(x, w1, b1, w2, b2))
    ref = _ref(x, w1, b1, w2, b2)
    assert out.shape == (batch, seq, d_model)
    assert jnp.allclose(out, ref, atol=1e-5, rtol=1e-5), "f32 mismatch"

    # 2) Tiled d_ff reduction path (f32, d_ff=256 as 2 x 128, acc scratch).
    d_ff2 = 256
    x2 = jax.random.normal(kx2, (batch, seq, d_model), dtype=jnp.float32)
    w1b, b1b, w2b, b2b = _make_params(kp2, d_model, d_ff2)
    out2 = jax.block_until_ready(
        position_wise_feed_forward(x2, w1b, b1b, w2b, b2b,
                                   tff=128, resident_weights=False))
    ref2 = _ref(x2, w1b, b1b, w2b, b2b)
    assert jnp.allclose(out2, ref2, atol=1e-4, rtol=1e-4), "d_ff-tiled mismatch"

    # 3) bf16 MXU operands with f32 accumulation (looser tolerance).
    out_bf16 = jax.block_until_ready(
        position_wise_feed_forward(x, w1, b1, w2, b2,
                                   compute_dtype=jnp.bfloat16))
    assert jnp.allclose(out_bf16, ref, atol=5e-2, rtol=5e-2), "bf16 mismatch"

    # 4) Row-padding path: rows=24 with tm=16 -> padded to 32, 2 row tiles.
    x3 = jax.random.normal(kx3, (3, 8, d_model), dtype=jnp.float32)
    out3 = jax.block_until_ready(
        position_wise_feed_forward(x3, w1, b1, w2, b2, tm=16))
    ref3 = _ref(x3, w1, b1, w2, b2)
    assert jnp.allclose(out3, ref3, atol=1e-5, rtol=1e-5), "padding mismatch"

    print("KERNEL_OK")
</pallas_src>

<mosaic_0001>
module attributes {stable_mosaic.version = 11 : i64} {
  func.func @ffn_kernel_single(%arg0: i32, %arg1: memref<8x32xf32, #tpu.memory_space<vmem>>, %arg2: memref<32x64xf32, #tpu.memory_space<vmem>>, %arg3: memref<1x64xf32, #tpu.memory_space<vmem>>, %arg4: memref<64x32xf32, #tpu.memory_space<vmem>>, %arg5: memref<1x32xf32, #tpu.memory_space<vmem>>, %arg6: memref<8x32xf32, #tpu.memory_space<vmem>>) attributes {dimension_semantics = [#tpu.dimension_semantics<parallel>], iteration_bounds = array<i64: 2>, scalar_prefetch = 0 : i64, scratch_operands = 0 : i64, tpu.core_type = #tpu.core_type<tc>, window_params = [{transform_indices = @transform_0, window_bounds = array<i64: 8, 32>}, {pipeline_mode = #tpu.pipeline_mode<synchronous>, transform_indices = @transform_1, window_bounds = array<i64: 32, 64>}, {pipeline_mode = #tpu.pipeline_mode<synchronous>, transform_indices = @transform_2, window_bounds = array<i64: 1, 64>}, {pipeline_mode = #tpu.pipeline_mode<synchronous>, transform_indices = @transform_3, window_bounds = array<i64: 64, 32>}, {pipeline_mode = #tpu.pipeline_mode<synchronous>, transform_indices = @transform_4, window_bounds = array<i64: 1, 32>}, {transform_indices = @transform_5, window_bounds = array<i64: 8, 32>}]} {
    %c0 = arith.constant 0 : index
    %c0_0 = arith.constant 0 : index
    %0 = vector.load %arg1[%c0, %c0_0] : memref<8x32xf32, #tpu.memory_space<vmem>>, vector<8x32xf32>
    %c0_1 = arith.constant 0 : index
    %c0_2 = arith.constant 0 : index
    %1 = vector.load %arg2[%c0_1, %c0_2] : memref<32x64xf32, #tpu.memory_space<vmem>>, vector<32x64xf32>
    %cst = arith.constant dense<0.000000e+00> : vector<8x64xf32>
    %2 = tpu.matmul %0, %1, %cst {dimension_numbers = #tpu.dot_dimension_numbers<[1], [0], [0], [1], [0, 0, 1, 1], [], []>} : vector<8x32xf32>, vector<32x64xf32>, vector<8x64xf32> -> vector<8x64xf32>
    %c0_3 = arith.constant 0 : index
    %c0_4 = arith.constant 0 : index
    %3 = vector.load %arg3[%c0_3, %c0_4] : memref<1x64xf32, #tpu.memory_space<vmem>>, vector<1x64xf32>
    %4 = vector.broadcast %3 : vector<1x64xf32> to vector<8x64xf32>
    %5 = arith.addf %2, %4 : vector<8x64xf32>
    %cst_5 = arith.constant 0.000000e+00 : f32
    %6 = vector.broadcast %cst_5 : f32 to vector<8x64xf32>
    %7 = arith.maximumf %5, %6 : vector<8x64xf32>
    %c0_6 = arith.constant 0 : index
    %c0_7 = arith.constant 0 : index
    %8 = vector.load %arg4[%c0_6, %c0_7] : memref<64x32xf32, #tpu.memory_space<vmem>>, vector<64x32xf32>
    %cst_8 = arith.constant dense<0.000000e+00> : vector<8x32xf32>
    %9 = tpu.matmul %7, %8, %cst_8 {dimension_numbers = #tpu.dot_dimension_numbers<[1], [0], [0], [1], [0, 0, 1, 1], [], []>} : vector<8x64xf32>, vector<64x32xf32>, vector<8x32xf32> -> vector<8x32xf32>
    %c0_9 = arith.constant 0 : index
    %c0_10 = arith.constant 0 : index
    %10 = vector.load %arg5[%c0_9, %c0_10] : memref<1x32xf32, #tpu.memory_space<vmem>>, vector<1x32xf32>
    %11 = vector.broadcast %10 : vector<1x32xf32> to vector<8x32xf32>
    %12 = arith.addf %9, %11 : vector<8x32xf32>
    %c0_11 = arith.constant 0 : index
    %c0_12 = arith.constant 0 : index
    %13 = vector.load %arg6[%c0_11, %c0_12] : memref<8x32xf32, #tpu.memory_space<vmem>>, vector<8x32xf32>
    tpu.vector_store %arg6[%c0_11, %c0_12], %12 {strides = array<i32>} : memref<8x32xf32, #tpu.memory_space<vmem>>, vector<8x32xf32>,
    return
  }
  func.func @transform_0(%arg0: i32) -> (i32, i32) {
    %c0_i32 = arith.constant 0 : i32
    %c0_i32_0 = arith.constant 0 : i32
    return %arg0, %c0_i32 : i32, i32
  }
  func.func @transform_1(%arg0: i32) -> (i32, i32) {
    %c0_i32 = arith.constant 0 : i32
    %c0_i32_0 = arith.constant 0 : i32
    %c0_i32_1 = arith.constant 0 : i32
    return %c0_i32, %c0_i32_0 : i32, i32
  }
  func.func @transform_2(%arg0: i32) -> (i32, i32) {
    %c0_i32 = arith.constant 0 : i32
    %c0_i32_0 = arith.constant 0 : i32
    %c0_i32_1 = arith.constant 0 : i32
    return %c0_i32, %c0_i32_0 : i32, i32
  }
  func.func @transform_3(%arg0: i32) -> (i32, i32) {
    %c0_i32 = arith.constant 0 : i32
    %c0_i32_0 = arith.constant 0 : i32
    %c0_i32_1 = arith.constant 0 : i32
    return %c0_i32, %c0_i32_0 : i32, i32
  }
  func.func @transform_4(%arg0: i32) -> (i32, i32) {
    %c0_i32 = arith.constant 0 : i32
    %c0_i32_0 = arith.constant 0 : i32
    %c0_i32_1 = arith.constant 0 : i32
    return %c0_i32, %c0_i32_0 : i32, i32
  }
  func.func @transform_5(%arg0: i32) -> (i32, i32) {
    %c0_i32 = arith.constant 0 : i32
    %c0_i32_0 = arith.constant 0 : i32
    return %arg0, %c0_i32 : i32, i32
  }
}

</mosaic_0001>

<bundles_post_ra>
// kernel: tpu_custom_call.1
= control target key start
LH: loop header
LB: loop body
LE: loop exit
PB: predicated region body
PF: predicated region fallthrough
CT: control target
= control target key end

     0   :  { %10 = vsyncpa [#allocation3], 0  ;;  %s642_s0 = inlined_call_operand.vmem [shape: f32[16,32], index: 0, kind: input, shape index: {}]   ;;  %s643_s1 = inlined_call_operand.vmem [shape: f32[32,64], index: 1, kind: input, shape index: {}]   ;;  %s644_s2 = inlined_call_operand.vmem [shape: f32[1,64], index: 2, kind: input, shape index: {}]   ;;  %s645_s3 = inlined_call_operand.vmem [shape: f32[64,32], index: 3, kind: input, shape index: {}]   ;;  %s646_s4 = inlined_call_operand.vmem [shape: f32[1,32], index: 4, kind: input, shape index: {}]   ;;  %s647_s5 = inlined_call_operand.hbm [shape: f32[16,32], index: 5, kind: output, shape index: {}]  }
   0x1   :  { %12 = vsyncpa [#allocation3 + $0x1], 0  ;;  %s513_s18 = smov 0   ;;  %s515_s19 = smov 0  }
   0x2   :  { %s517_s20 = smov 0   ;;  %s519_s21 = smov 0  }
   0x3 LB: > { %s534_s22 = sadd.s32 4294967295, %s481_s21   ;;  %s366_s23 = sadd.s32 4294967294, %s481_s21   ;;  %s481_s21 = sphi %s519_s21, %s653_s21   ;;  %s477_s20 = sphi %s517_s20, %s652_s20   ;;  %s473_s19 = sphi %s515_s19, %s651_s19   ;;  %s469_s18 = sphi %s513_s18, %s650_s18  }
   0x4   : > { %s538_s24 = sadd.s32 1, %s481_s21   ;;  %s135_s25 = sadd.s32 1, %s477_s20 }
   0x5   : > { %s132_s26 = ssub.s32 %s481_s21, %s538_s24  ;;  %p145_p0 = scmp.ne.s32.totalorder %s477_s20, %s473_s19 }
   0x6   : > { %p133_p1 = scmp.eq.s32.totalorder %s132_s26, 0  ;;  %p146_p2 = scmp.eq.s32.totalorder %s534_s22, 1 }
   0x7   : > { %p151_p3 = scmp.ne.s32.totalorder %s473_s19, %s469_s18  ;;  %p152_p4 = scmp.eq.s32.totalorder %s366_s23, 1 }
   0x8   : > { %s549_s27 = scalar_select %p133_p1, %s477_s20, %s135_s25  }
   0x9   : > { %p551_p5 = por %p146_p2, %p145_p0  ;;  %p555_p6 = por %p152_p4, %p151_p3 }
   0xa   : > { %p369_p7 = scmp.ge.s32.totalorder %s481_s21, 1  ;;  %p189_p8 = scmp.lt.s32.totalorder %s481_s21, 3 }
   0xc   : > { %p190_p9 = pnand %p369_p7, %p189_p8 }
   0xd   : > { %p216_p10 = scmp.lt.s32.totalorder (!%p190_p9), %s534_s22, 1  ;;  %s375_s6 = sshll.u32 (!%p190_p9), %s534_s22, 3 }
   0xe   : > { %193 = sbr.rel (%p190_p9) target bundleno = 288 (0x120), region = 40  ;;  %s302_s9 = scalar_lea.hbm (!%p190_p9), %s647_s5, %s375_s6 }
   0xf   : > { %s306_s14 = sshll.u32 (!%p190_p9), %s302_s9, 4  ;;  %s439_s25 = scalar_lea.hbm (!%p190_p9), %s647_s5, 16  ;;  %s307_s14 = int_to_ptr.hbm [resolvable:$true] %s306_s14 }
  0x13   : > { %v224_v0 = vld [vmem:[%s643_s1 + $0x18] sm:$0xff]  ;;  %v223_v1 = vld [vmem:[%s643_s1 + $0x10] sm:$0xff]  ;;  %v222_v4 = vld [vmem:[%s643_s1 + $0x8] sm:$0xff]  ;;  %s217_s15 = scalar_select %p216_p10, %s534_s22, 1  ;;  %vm229_vm0 = vcmask 261120   ;;  %vm266_vm1 = vcmask 523264  }
  0x14   : > { %245 = vmatpush.msra.mxu0 %v224_v0  ;;  %v261_v2 = vld [vmem:[%s645_s3 + $0x38] sm:$0xff]  ;;  %v260_v3 = vld [vmem:[%s645_s3 + $0x30] sm:$0xff]  ;;  %v259_v5 = vld [vmem:[%s645_s3 + $0x28] sm:$0xff]  ;;  %s433_s22 = sshra.s32 %s307_s14, 4  ;;  %s434_s22 = int_to_ptr.hbm [resolvable:$true] %s433_s22 }
  0x15   : > { %278 = vmatpush.msra.mxu1 %v261_v2  ;;  %v221_v6 = vld [vmem:[%s643_s1] sm:$0xff]  ;;  %s371_s26 = sshll.u32 %s217_s15, 3  ;;  %v257_v9 = vld [vmem:[%s645_s3 + $0x18] sm:$0xff]  ;;  %v256_v10 = vld [vmem:[%s645_s3 + $0x10] sm:$0xff]  ;;  %s435_s16 = scalar_lea.hbm %s434_s22, 8 }
  0x16   : > { %246 = vmatpush.msra.mxu0 %v223_v1  ;;  %s219_s7 = scalar_lea.vmem %s642_s0, %s371_s26  ;;  %v258_v7 = vld [vmem:[%s645_s3 + $0x20] sm:$0xff]  ;;  %v255_v11 = vld [vmem:[%s645_s3 + $0x8] sm:$0xff]  ;;  %s213_s26 = sand.u32 1, %s473_s19  }
  0x17   : > { %279 = vmatpush.msra.mxu1 %v260_v3  ;;  %v220_v8 = vld [vmem:[%s219_s7] sm:$0xff]  ;;  %s370_s30 = sshll.u32 %s213_s26, 3  ;;  %s292_s15 = scalar_lea.sflag [#allocation3], %s213_s26 }
  0x18   : > { %247 = vmatpush.msra.mxu0 %v222_v4  ;;  %v254_v12 = vld [vmem:[%s645_s3] sm:$0xff]  ;;  %s215_s12 = scalar_lea.vmem [#allocation2], %s370_s30  ;;  %p436_p11 = scmp.ne.s32.totalorder %s434_s22, %s435_s16 }
  0x19   : > { %280 = vmatpush.msra.mxu1 %v259_v5  ;;  %v417_v13 = vld [vmem:[%s644_s2] ss:$0 sm:$0xff]  ;;  %s304_s13 = sshll.u32 %s215_s12, 4  ;;  %p440_p0 = scmp.lt.s32.totalorder %s434_s22, %s647_s5  ;;  %s305_s13 = int_to_ptr.vmem [resolvable:$true] %s304_s13 }
  0x1a   : > { %248 = vmatpush.msra.mxu0 %v221_v6  ;;  %v418_v17 = vld [vmem:[%s646_s4] ss:$0 sm:$0xff]  ;;  %p437_p12 = pnand %p436_p11, %p551_p5  ;;  %p441_p1 = scmp.lt.s32.totalorder %s439_s25, %s435_s16 }
  0x1b   : > { %372 = vmatmul.msk.f32.vlgmr.msra.gmra.mxu0 %vm229_vm0, %v220_v8  ;;  %281 = vmatpush.msra.mxu1 %v258_v7 }
  0x1c   : > { %p438_p13 = pneg %p437_p12  ;;  %p442_p2 = por %p441_p1, %p440_p0 }
  0x1d   : > { %282 = vmatpush.msra.mxu1 %v257_v9 }
  0x1e   : > { %p443_p3 = pnand %p442_p2, %p438_p13 }
  0x1f   : > { %283 = vmatpush.msra.mxu1 %v256_v10 }
  0x21   : > { %284 = vmatpush.msra.mxu1 %v255_v11 }
  0x23   : > { %285 = vmatpush.msra.mxu1 %v254_v12 }
  0x98   : > { %v250_v14 = vpop.f32.mrf.mxu0 }
  0x99   : > { %v251_v15 = vadd.f32 %v417_v13, %v250_v14 }
  0x9b   : > { %v253_v16 = vmax.f32 %v251_v15, 0.0 }
  0x9d   : > { %373 = vmatmul.msk.f32.vlgmr.msra.gmra.mxu1 %vm266_vm1, %v253_v16 }
 0x11a   : > { %v287_v18 = vpop.f32.mrf.mxu1 }
 0x11b   : > { %v288_v19 = vadd.f32 %v418_v17, %v287_v18 }
 0x11d   : > { %290 = vst.msk [vmem:[%s215_s12] sm:$0xff] %vm229_vm0, %v288_v19 }
 0x11e   : > { %446 = shalt.err (!%p443_p3)
}
 0x11f   : > { %378 = dma.vmem_to_hbm [thread:$0]  (%p551_p5), %s305_s13, 128, %s307_s14, %s292_s15  }
 0x120 PF: > { %p384_p4 = scmp.ge.s32.totalorder %s481_s21, 2  ;;  %s318_s26 = sand.u32 1, %s469_s18  }
 0x121   : > { %s319_s7 = scalar_lea.sflag [#allocation3], %s318_s26 }
 0x122   : > { %p381_p7 = pnand %p384_p4, %p555_p6 }
 0x124   : > { %p382_p8 = pneg %p381_p7 }
 0x126   : > { %464 = dma.done.wait (%p382_p8), %s319_s7, 128  }
 0x127   : > { %466 = vsyncadd (%p382_p8), %s319_s7, 4294967168  ;;  %p15_p9 = scmp.ge.s32.totalorder %s538_s24, 4   ;;  %s650_s18 = smov %s473_s19 }
 0x128   : > { %s651_s19 = smov %s477_s20  ;;  %s652_s20 = smov %s549_s27 }
 0x129   : > { %s653_s21 = smov %s538_s24  ;;  %17 = sbr.rel (!%p15_p9) target bundleno = 3 (0x3), region = 75 }
 0x12e   :  { %325 = vsyncpa [#allocation3], 1 }
 0x12f   :  { %327 = vsyncpa [#allocation3 + $0x1], 1 }

</bundles_post_ra>
